<compile_context>
chip_gen: v7x
topology: tpu7x:2x2x1
jax: 0.10.0
libtpu: 0.0.40
codegen_flags: <defaults>
</compile_context>

<pallas_src>
import functools

import jax
import jax.numpy as jnp
from jax.experimental import pallas as pl
from jax.experimental.pallas import tpu as pltpu

LANES = 128
ROW_ALIGN = 32                      # int8 native tile is (32,128)
TARGET_BLOCK_BYTES = 4 * 1024 * 1024   # ~4 MiB input block per grid step
VMEM_LIMIT_BYTES = 32 * 1024 * 1024    # safe on v5e/v6e (128 MiB) and v7x (64 MiB)


def _cdiv(a, b):
    return -(-a // b)


def _round_up(a, b):
    return _cdiv(a, b) * b


# ---------------------------------------------------------------------------
# Kernel 1: global min / max reduction.
# Grid = (outer, inner). Each outer index owns a resident (1,1,128) partial
# min/max output block accumulated across the inner ("arbitrary") axis.
# outer is "parallel" (both TensorCores on v7x).  A ragged last row-block is
# masked with +/-inf; the mask path only runs on that one block (pl.when).
# ---------------------------------------------------------------------------
def _minmax_kernel(x_ref, min_ref, max_ref, *, inner, nblocks, rows,
                   block_rows, ragged, hi_fill, lo_fill):
    j = pl.program_id(1)

    @pl.when(j == 0)
    def _():
        min_ref[...] = jnp.full_like(min_ref, jnp.inf)
        max_ref[...] = jnp.full_like(max_ref, -jnp.inf)

    blk = x_ref[...]                                   # native dtype (bf16 ok)

    def _accumulate(src_min, src_max):
        bmin = jnp.min(src_min, axis=0, keepdims=True).astype(jnp.float32)[None]
        bmax = jnp.max(src_max, axis=0, keepdims=True).astype(jnp.float32)[None]
        min_ref[...] = jnp.minimum(min_ref[...], bmin)
        max_ref[...] = jnp.maximum(max_ref[...], bmax)

    if not ragged:
        _accumulate(blk, blk)
    else:
        i = pl.program_id(0)
        b = jnp.minimum(i * inner + j, nblocks - 1)    # clamp surplus step
        rem = rows - b * block_rows                    # valid rows this block

        @pl.when(rem >= block_rows)                    # full block: no mask
        def _():
            _accumulate(blk, blk)

        @pl.when(rem < block_rows)                     # ragged last block
        def _():
            row_ids = jax.lax.broadcasted_iota(jnp.int32, (block_rows, LANES), 0)
            valid = row_ids < rem
            _accumulate(jnp.where(valid, blk, hi_fill),
                        jnp.where(valid, blk, lo_fill))


def _global_minmax(x2d, block_rows, nblocks, rows, ragged):
    outer = 2 if nblocks >= 2 else 1
    inner = _cdiv(nblocks, outer)

    dtype = x2d.dtype
    if jnp.issubdtype(dtype, jnp.floating):
        hi_fill, lo_fill = float("inf"), float("-inf")
    else:
        hi_fill, lo_fill = int(jnp.iinfo(dtype).max), int(jnp.iinfo(dtype).min)

    kernel = functools.partial(
        _minmax_kernel, inner=inner, nblocks=nblocks, rows=rows,
        block_rows=block_rows, ragged=ragged, hi_fill=hi_fill, lo_fill=lo_fill)

    def x_map(i, j):
        # Clamp so the surplus step (odd nblocks, 2nd core) re-reads the last
        # block; min/max re-accumulation is idempotent.
        return (jnp.minimum(i * inner + j, nblocks - 1), 0)

    min_p, max_p = pl.pallas_call(
        kernel,
        out_shape=(jax.ShapeDtypeStruct((outer, 1, LANES), jnp.float32),
                   jax.ShapeDtypeStruct((outer, 1, LANES), jnp.float32)),
        grid_spec=pltpu.PrefetchScalarGridSpec(
            num_scalar_prefetch=0,
            grid=(outer, inner),
            in_specs=[pl.BlockSpec((block_rows, LANES), x_map)],
            out_specs=[pl.BlockSpec((1, 1, LANES), lambda i, j: (i, 0, 0)),
                       pl.BlockSpec((1, 1, LANES), lambda i, j: (i, 0, 0))]),
        compiler_params=pltpu.CompilerParams(
            dimension_semantics=("parallel", "arbitrary"),
            vmem_limit_bytes=VMEM_LIMIT_BYTES),
    )(x2d)
    return min_p, max_p


# ---------------------------------------------------------------------------
# Kernel 2: elementwise quantization.  The tiny (outer,1,128) min/max partials
# ride along as resident VMEM blocks; the scalar combine / step / reciprocal /
# offset happen in-kernel (a couple of XLU+EUP ops per 4 MiB block), so no
# serializing XLA scalar op sits between the two pallas_calls.
#   q = round(x * inv_step - offset),  offset = min*inv_step + 2**(bits-1)
# ---------------------------------------------------------------------------
def _quantize_kernel(minp_ref, maxp_ref, x_ref, o_ref, *, levels, half):
    minv = jnp.min(minp_ref[...])
    maxv = jnp.max(maxp_ref[...])
    step = (maxv - minv) / levels
    inv_step = jnp.where(step > 0.0, 1.0 / step, 0.0)   # constant-input guard
    offset = minv * inv_step + half
    x = x_ref[...].astype(jnp.float32)
    q = jnp.round(x * inv_step - offset)
    o_ref[...] = q.astype(jnp.int32).astype(o_ref.dtype)


def _quantize(x2d, min_p, max_p, out_dtype, block_rows, nblocks, levels, half):
    rows = x2d.shape[0]
    outer = min_p.shape[0]
    kernel = functools.partial(_quantize_kernel, levels=levels, half=half)
    return pl.pallas_call(
        kernel,
        out_shape=jax.ShapeDtypeStruct((rows, LANES), out_dtype),
        grid_spec=pltpu.PrefetchScalarGridSpec(
            num_scalar_prefetch=0,
            grid=(nblocks,),
            in_specs=[pl.BlockSpec((outer, 1, LANES), lambda i: (0, 0, 0)),
                      pl.BlockSpec((outer, 1, LANES), lambda i: (0, 0, 0)),
                      pl.BlockSpec((block_rows, LANES), lambda i: (i, 0))],
            out_specs=pl.BlockSpec((block_rows, LANES), lambda i: (i, 0))),
        compiler_params=pltpu.CompilerParams(
            dimension_semantics=("parallel",),
            vmem_limit_bytes=VMEM_LIMIT_BYTES),
    )(min_p, max_p, x2d)


# ---------------------------------------------------------------------------
# Module-equivalent wrapper (QSendLayerGloo.forward)
# ---------------------------------------------------------------------------
def qsend_layer_gloo_forward(x, bits=8, send_rank=1, rank=0):
    """Returns (output, min_step, quantized_payload).

    `output`   : x unchanged (the PyTorch forward returns its input).
    `min_step` : [min, step] float32, shape (2,)  (the module's buffer).
    `quantized`: what would be dist.send()'d, same shape as x, int8/16/32.
    """
    orig_shape = x.shape
    total = int(x.size)

    # Lane-dense 2D slab in the input's native dtype.  Pad is at most 127
    # elements (edge value -> does not affect min/max; trimmed from q below).
    flat = x.reshape(-1)
    padded_total = _round_up(total, LANES)
    if padded_total != total:
        flat = jnp.pad(flat, (0, padded_total - total), mode="edge")
    rows = padded_total // LANES
    x2d = flat.reshape(rows, LANES)

    # ~4 MiB input blocks (dtype-aware), aligned to the int8 (32,128) tile.
    itemsize = jnp.dtype(x.dtype).itemsize
    max_block_rows = max(
        ROW_ALIGN, (TARGET_BLOCK_BYTES // (LANES * itemsize)) // ROW_ALIGN * ROW_ALIGN)
    if rows <= max_block_rows:
        block_rows, nblocks = rows, 1
    else:
        block_rows = max_block_rows
        nblocks = _cdiv(rows, block_rows)
    ragged = nblocks > 1 and (rows % block_rows) != 0

    min_p, max_p = _global_minmax(x2d, block_rows, nblocks, rows, ragged)

    levels = float(2 ** bits - 1)
    half = float(2 ** (bits - 1))

    # Tiny (<=2*128 element) combine for the returned min_step buffer; the
    # quantize kernel recomputes the same scalars internally and does not
    # depend on these ops.
    minv = jnp.min(min_p)
    maxv = jnp.max(max_p)
    step = (maxv - minv) / levels
    min_step = jnp.stack([minv, step]).astype(jnp.float32)

    if bits <= 8:
        out_dtype = jnp.int8
    elif bits <= 16:
        out_dtype = jnp.int16
    else:
        out_dtype = jnp.int32

    q2d = _quantize(x2d, min_p, max_p, out_dtype, block_rows, nblocks, levels, half)
    if padded_total != total:
        q = q2d.reshape(-1)[:total].reshape(orig_shape)
    else:
        q = q2d.reshape(orig_shape)

    # TODO(synk): dist.send(min_step, send_rank) / dist.send(q, send_rank)
    # (gloo CPU point-to-point) has no single-chip Pallas equivalent; the
    # payload is returned instead of sent.
    return x, min_step, q


def _reference(x, bits):
    xf = x.astype(jnp.float32)
    mn = jnp.min(xf)
    mx = jnp.max(xf)
    st = (mx - mn) / (2.0 ** bits - 1.0)
    q = jnp.round((xf - mn) / st - 2.0 ** (bits - 1)).astype(jnp.int32)
    return mn, st, q


def _check(x, bits, expect_dtype):
    out, min_step, q = qsend_layer_gloo_forward(x, bits=bits, send_rank=1, rank=0)
    jax.block_until_ready((out, min_step, q))
    r_min, r_step, r_q = _reference(x, bits)
    assert out.shape == x.shape and out.dtype == x.dtype
    assert bool(jnp.all(out == x))
    assert min_step.shape == (2,) and min_step.dtype == jnp.float32
    assert jnp.allclose(min_step[0], r_min, rtol=1e-6, atol=1e-6)
    assert jnp.allclose(min_step[1], r_step, rtol=1e-6, atol=1e-6)
    assert q.dtype == expect_dtype and q.shape == x.shape
    # reciprocal-multiply + offset form vs true divide may differ by 1 at ties
    assert int(jnp.max(jnp.abs(q.astype(jnp.int32) - r_q))) <= 1


if __name__ == "__main__":
    key = jax.random.PRNGKey(0)
    k1, k2, k3, k4 = jax.random.split(key, 4)

    # 1) small NCHW f32: single block, no pad, int8 output
    x1 = jax.random.normal(k1, (2, 4, 16, 16), dtype=jnp.float32)
    _check(x1, bits=8, expect_dtype=jnp.int8)

    # 2) bf16 activations: native-dtype reduce path, single 1 MiB block
    x2 = jax.random.normal(k2, (8, 64, 32, 32), dtype=jnp.bfloat16)
    _check(x2, bits=8, expect_dtype=jnp.int8)

    # 3) multi-block f32: odd nblocks (megacore clamp) + ragged last block
    x3 = jax.random.normal(k3, (33, 64, 32, 32), dtype=jnp.float32)
    _check(x3, bits=8, expect_dtype=jnp.int8)

    # 4) awkward total (not a multiple of 128): lane pad path, int16 output
    x4 = jax.random.normal(k4, (3, 5, 7, 11), dtype=jnp.float32)
    _check(x4, bits=16, expect_dtype=jnp.int16)

    print("KERNEL_OK")
</pallas_src>

<mosaic_0001>
module attributes {stable_mosaic.version = 11 : i64} {
  func.func @_minmax_kernel(%arg0: i32, %arg1: i32, %arg2: memref<16x128xf32, #tpu.memory_space<vmem>>, %arg3: memref<1x1x128xf32, #tpu.memory_space<vmem>>, %arg4: memref<1x1x128xf32, #tpu.memory_space<vmem>>) attributes {dimension_semantics = [#tpu.dimension_semantics<parallel>, #tpu.dimension_semantics<arbitrary>], iteration_bounds = array<i64: 1, 1>, scalar_prefetch = 0 : i64, scratch_operands = 0 : i64, tpu.core_type = #tpu.core_type<tc>, window_params = [{transform_indices = @transform_0, window_bounds = array<i64: 16, 128>}, {transform_indices = @transform_1, window_bounds = array<i64: 1, 1, 128>}, {transform_indices = @transform_2, window_bounds = array<i64: 1, 1, 128>}]} {
    %c0_i32 = arith.constant 0 : i32
    %0 = arith.cmpi eq, %arg1, %c0_i32 : i32
    %1 = arith.extui %0 : i1 to i32
    %c0_i32_0 = arith.constant 0 : i32
    %2 = arith.cmpi ne, %1, %c0_i32_0 : i32
    scf.if %2 {
      %cst_15 = arith.constant 0x7F800000 : f32
      %16 = vector.broadcast %cst_15 : f32 to vector<1x1x128xf32>
      %c0_16 = arith.constant 0 : index
      %c0_17 = arith.constant 0 : index
      %c0_18 = arith.constant 0 : index
      %17 = vector.load %arg3[%c0_16, %c0_17, %c0_18] : memref<1x1x128xf32, #tpu.memory_space<vmem>>, vector<1x1x128xf32>
      tpu.vector_store %arg3[%c0_16, %c0_17, %c0_18], %16 {strides = array<i32>} : memref<1x1x128xf32, #tpu.memory_space<vmem>>, vector<1x1x128xf32>,
      %cst_19 = arith.constant 0xFF800000 : f32
      %18 = vector.broadcast %cst_19 : f32 to vector<1x1x128xf32>
      %c0_20 = arith.constant 0 : index
      %c0_21 = arith.constant 0 : index
      %c0_22 = arith.constant 0 : index
      %19 = vector.load %arg4[%c0_20, %c0_21, %c0_22] : memref<1x1x128xf32, #tpu.memory_space<vmem>>, vector<1x1x128xf32>
      tpu.vector_store %arg4[%c0_20, %c0_21, %c0_22], %18 {strides = array<i32>} : memref<1x1x128xf32, #tpu.memory_space<vmem>>, vector<1x1x128xf32>,
    } else {
    }
    %c0 = arith.constant 0 : index
    %c0_1 = arith.constant 0 : index
    %3 = vector.load %arg2[%c0, %c0_1] : memref<16x128xf32, #tpu.memory_space<vmem>>, vector<16x128xf32>
    %cst = arith.constant dense<0x7F800000> : vector<128xf32>
    %4 = vector.multi_reduction <minimumf>, %3, %cst [0] : vector<16x128xf32> to vector<128xf32>
    %5 = vector.shape_cast %4 : vector<128xf32> to vector<1x128xf32>
    %6 = vector.shape_cast %5 : vector<1x128xf32> to vector<1x1x128xf32>
    %cst_2 = arith.constant dense<0xFF800000> : vector<128xf32>
    %7 = vector.multi_reduction <maximumf>, %3, %cst_2 [0] : vector<16x128xf32> to vector<128xf32>
    %8 = vector.shape_cast %7 : vector<128xf32> to vector<1x128xf32>
    %9 = vector.shape_cast %8 : vector<1x128xf32> to vector<1x1x128xf32>
    %c0_3 = arith.constant 0 : index
    %c0_4 = arith.constant 0 : index
    %c0_5 = arith.constant 0 : index
    %10 = vector.load %arg3[%c0_3, %c0_4, %c0_5] : memref<1x1x128xf32, #tpu.memory_space<vmem>>, vector<1x1x128xf32>
    %11 = arith.minimumf %10, %6 : vector<1x1x128xf32>
    %c0_6 = arith.constant 0 : index
    %c0_7 = arith.constant 0 : index
    %c0_8 = arith.constant 0 : index
    %12 = vector.load %arg3[%c0_6, %c0_7, %c0_8] : memref<1x1x128xf32, #tpu.memory_space<vmem>>, vector<1x1x128xf32>
    tpu.vector_store %arg3[%c0_6, %c0_7, %c0_8], %11 {strides = array<i32>} : memref<1x1x128xf32, #tpu.memory_space<vmem>>, vector<1x1x128xf32>,
    %c0_9 = arith.constant 0 : index
    %c0_10 = arith.constant 0 : index
    %c0_11 = arith.constant 0 : index
    %13 = vector.load %arg4[%c0_9, %c0_10, %c0_11] : memref<1x1x128xf32, #tpu.memory_space<vmem>>, vector<1x1x128xf32>
    %14 = arith.maximumf %13, %9 : vector<1x1x128xf32>
    %c0_12 = arith.constant 0 : index
    %c0_13 = arith.constant 0 : index
    %c0_14 = arith.constant 0 : index
    %15 = vector.load %arg4[%c0_12, %c0_13, %c0_14] : memref<1x1x128xf32, #tpu.memory_space<vmem>>, vector<1x1x128xf32>
    tpu.vector_store %arg4[%c0_12, %c0_13, %c0_14], %14 {strides = array<i32>} : memref<1x1x128xf32, #tpu.memory_space<vmem>>, vector<1x1x128xf32>,
    return
  }
  func.func @transform_0(%arg0: i32, %arg1: i32) -> (i32, i32) {
    %c1_i32 = arith.constant 1 : i32
    %0 = arith.muli %arg0, %c1_i32 : i32
    %1 = arith.addi %0, %arg1 : i32
    %c0_i32 = arith.constant 0 : i32
    %2 = arith.minsi %1, %c0_i32 : i32
    %c0_i32_0 = arith.constant 0 : i32
    %c0_i32_1 = arith.constant 0 : i32
    return %2, %c0_i32_0 : i32, i32
  }
  func.func @transform_1(%arg0: i32, %arg1: i32) -> (i32, i32, i32) {
    %c0_i32 = arith.constant 0 : i32
    %c0_i32_0 = arith.constant 0 : i32
    %c0_i32_1 = arith.constant 0 : i32
    return %arg0, %c0_i32, %c0_i32_0 : i32, i32, i32
  }
  func.func @transform_2(%arg0: i32, %arg1: i32) -> (i32, i32, i32) {
    %c0_i32 = arith.constant 0 : i32
    %c0_i32_0 = arith.constant 0 : i32
    %c0_i32_1 = arith.constant 0 : i32
    return %arg0, %c0_i32, %c0_i32_0 : i32, i32, i32
  }
}

</mosaic_0001>

<bundles_post_ra>
// kernel: tpu_custom_call.1
= control target key start
LH: loop header
LB: loop body
LE: loop exit
PB: predicated region body
PF: predicated region fallthrough
CT: control target
= control target key end

     0   :  { %8 = vsyncpa [#allocation3], 0  ;;  %s240_s0 = inlined_call_operand.hbm [shape: f32[16,128], index: 0, kind: input, shape index: {}]   ;;  %s241_s1 = inlined_call_operand.hbm [shape: f32[1,1,128], index: 1, kind: output, shape index: {0}]   ;;  %s242_s2 = inlined_call_operand.hbm [shape: f32[1,1,128], index: 2, kind: output, shape index: {1}]  }
   0x1   :  { %9 = vsyncpa [#allocation4], 0 }
   0x2   :  { %10 = vsyncpa [#allocation7], 0  ;;  %s174_s9 = smov [#allocation2]   ;;  %s102_s13 = scalar_lea.hbm %s240_s0, 256 }
   0x3   :  { %s22_s10 = sshll.u32 %s174_s9, 4  ;;  %p103_p0 = scmp.ne.s32.totalorder %s240_s0, %s102_s13  ;;  %s23_s10 = int_to_ptr.vmem [resolvable:$true] %s22_s10 }
   0x4   :  { %p106_p1 = scmp.lt.u32.totalorder %s102_s13, %s240_s0 }
   0x6   :  { %p108_p2 = pnand %p106_p1, %p103_p0 }
   0x8   :  { %111 = shalt.err (!%p108_p2)
}
   0x9   :  { %s112_s18 = scalar_lea.vmem %s23_s10, 256  ;;  %p117_p4 = scmp.lt.s32.totalorder %s23_s10, %s23_s10 }
   0xa   :  { %p113_p3 = scmp.ne.s32.totalorder %s23_s10, %s112_s18  ;;  %p118_p5 = scmp.lt.s32.totalorder %s112_s18, %s112_s18 }
   0xc   :  { %p119_p6 = por %p118_p5, %p117_p4 }
   0xe   :  { %p120_p7 = pnand %p119_p6, %p113_p3 }
  0x10   :  { %123 = shalt.err (!%p120_p7)
}
  0x11   :  { %s175_s19 = smov 128   ;;  %s176_s20 = smov 8  }
  0x12   :  { %28 = dma.hbm_to_vmem [thread:$0]  %s240_s0, 256, %s23_s10, [#allocation3], %s175_s19, %s175_s19, %s176_s20  }
  0x13   :  { %168 = dma.done.wait [#allocation3], 256  }
  0x14   :  { %169 = vsyncadd [#allocation3], 4294967040  ;;  %v177_v0 = vmov inf   ;;  %v178_v1 = vmov -inf   ;;  %v42_v2 = vld [vmem:[#allocation2] sm:$0xff]  ;;  %v43_v3 = vld [vmem:[#allocation2 + $0x8] sm:$0xff] }
  0x15   :  { %40 = vst [vmem:[#allocation5] sm:$0x1] %v177_v0  ;;  %41 = vst [vmem:[#allocation6] sm:$0x1] %v178_v1  ;;  %v44_v4 = vmin.f32 %v42_v2, %v43_v3  ;;  %v51_v5 = vmax.f32 %v42_v2, %v43_v3  ;;  %s179_s0 = smov [#allocation5]   ;;  %s180_s24 = smov [#allocation6]  }
  0x16   :  { %s70_s23 = sshll.u32 %s179_s0, 4  ;;  %s80_s25 = sshll.u32 %s180_s24, 4  ;;  %s71_s23 = int_to_ptr.vmem [resolvable:$true] %s70_s23  ;;  %s208_s25 = int_to_ptr.vmem [resolvable:$true] %s80_s25 }
  0x17   :  { %v45_v6 = vrot.slane %v44_v4, 4  ;;  %v52_v7 = vrot.slane %v51_v5, 4  ;;  %s124_s26 = scalar_lea.vmem %s71_s23, 16  ;;  %s128_s27 = scalar_lea.vmem %s71_s23, 32 }
  0x18   :  { %p125_p8 = scmp.ne.s32.totalorder %s71_s23, %s124_s26  ;;  %p129_p9 = scmp.lt.s32.totalorder %s71_s23, %s71_s23 }
  0x19   :  { %v46_v8 = vmin.f32 %v44_v4, %v45_v6  ;;  %v53_v9 = vmax.f32 %v51_v5, %v52_v7  ;;  %p130_p10 = scmp.lt.s32.totalorder %s128_s27, %s124_s26 }
  0x1b   :  { %v47_v10 = vrot.slane %v46_v8, 2  ;;  %v54_v11 = vrot.slane %v53_v9, 2  ;;  %p131_p11 = por %p130_p10, %p129_p9 }
  0x1c   :  { %v58_v16 = vld [vmem:[#allocation5] sm:$0x1]  ;;  %v61_v17 = vld [vmem:[#allocation6] sm:$0x1] }
  0x1d   :  { %v48_v12 = vmin.f32 %v46_v8, %v47_v10  ;;  %v55_v13 = vmax.f32 %v53_v9, %v54_v11  ;;  %p132_p12 = pnand %p131_p11, %p125_p8 }
  0x1f   :  { %v49_v14 = vrot.slane %v48_v12, 1  ;;  %v56_v15 = vrot.slane %v55_v13, 1 }
  0x21   :  { %v50_v18 = vmin.f32 %v48_v12, %v49_v14  ;;  %v57_v19 = vmax.f32 %v55_v13, %v56_v15 }
  0x23   :  { %v59_v20 = vmin.f32 %v58_v16, %v50_v18  ;;  %v62_v21 = vmax.f32 %v61_v17, %v57_v19 }
  0x25   :  { %60 = vst [vmem:[#allocation5] sm:$0x1] %v59_v20  ;;  %63 = vst [vmem:[#allocation6] sm:$0x1] %v62_v21 }
  0x26   :  { %135 = shalt.err (!%p132_p12)
}
  0x27   :  { %s136_s30 = scalar_lea.hbm %s241_s1, 16 }
  0x28   :  { %p137_p13 = scmp.ne.s32.totalorder %s241_s1, %s136_s30  ;;  %p140_p0 = scmp.lt.u32.totalorder %s136_s30, %s241_s1 }
  0x2a   :  { %p142_p1 = pnand %p140_p0, %p137_p13 }
  0x2c   :  { %145 = shalt.err (!%p142_p1)
}
  0x2d   :  { %73 = dma.vmem_to_hbm [thread:$0]  %s71_s23, 16, %s241_s1, [#allocation4]  }
  0x2e   :  { %s146_s9 = scalar_lea.vmem %s208_s25, 16  ;;  %s150_s10 = scalar_lea.vmem %s208_s25, 32 }
  0x2f   :  { %p147_p2 = scmp.ne.s32.totalorder %s208_s25, %s146_s9  ;;  %p151_p3 = scmp.lt.s32.totalorder %s208_s25, %s208_s25 }
  0x30   :  { %p152_p4 = scmp.lt.s32.totalorder %s150_s10, %s146_s9 }
  0x32   :  { %p153_p5 = por %p152_p4, %p151_p3 }
  0x34   :  { %p154_p6 = pnand %p153_p5, %p147_p2 }
  0x36   :  { %157 = shalt.err (!%p154_p6)
}
  0x37   :  { %s158_s13 = scalar_lea.hbm %s242_s2, 16 }
  0x38   :  { %p159_p7 = scmp.ne.s32.totalorder %s242_s2, %s158_s13  ;;  %p162_p8 = scmp.lt.u32.totalorder %s158_s13, %s242_s2 }
  0x3a   :  { %p164_p9 = pnand %p162_p8, %p159_p7 }
  0x3c   :  { %167 = shalt.err (!%p164_p9)
}
  0x3d   :  { %83 = dma.vmem_to_hbm [thread:$0]  %s208_s25, 16, %s242_s2, [#allocation7]  }
  0x3e   :  { %170 = dma.done.wait [#allocation4], 16  }
  0x3f   :  { %171 = vsyncadd [#allocation4], 4294967280 }
  0x40   :  { %172 = dma.done.wait [#allocation7], 16  }
  0x41   :  { %173 = vsyncadd [#allocation7], 4294967280 }
  0x42   :  { %90 = vsyncpa [#allocation3], 1 }
  0x43   :  { %91 = vsyncpa [#allocation4], 1 }
  0x44   :  { %92 = vsyncpa [#allocation7], 1 }

</bundles_post_ra>
